<compile_context>
chip_gen: v5e
topology: v5e:2x2
jax: 0.10.0
libtpu: 0.0.40
codegen_flags: <defaults>
</compile_context>

<pallas_src>
import jax
import jax.numpy as jnp
import numpy as np
from jax.experimental import pallas as pl
from jax.experimental.pallas import tpu as pltpu

# ----------------------------- configuration --------------------------------
BATCH = 2
VOCAB_SIZE = 10        # C  (second dim of the input)
HIDDEN = 32            # T  (last dim of the input; Adapter width)
HALF = HIDDEN // 2     # Adapter bottleneck width
JOINT_CHANNELS = 12    # prediction-head output channels

LANES = VOCAB_SIZE * HIDDEN       # 320 : flattened feature axis (lane dim)
BOTTLENECK = VOCAB_SIZE * HALF    # 160 : flattened bottleneck axis
W320_ROWS = BOTTLENECK + JOINT_CHANNELS   # 172 rows in the 320-lane weight slab


# ----------------------------- exact GELU ------------------------------------
def _erf_approx(x):
    # Abramowitz & Stegun 7.1.26 rational approximation, |error| < 1.5e-7.
    # Built only from abs / where / exp / mul / add / div so it is guaranteed
    # to lower on the TPU VPU/EUP (no erf primitive required).
    a1, a2, a3, a4, a5 = 0.254829592, -0.284496736, 1.421413741, -1.453152027, 1.061405429
    p = 0.3275911
    ax = jnp.abs(x)
    t = 1.0 / (1.0 + p * ax)
    poly = ((((a5 * t + a4) * t + a3) * t + a2) * t + a1) * t
    e = 1.0 - poly * jnp.exp(-ax * ax)
    return jnp.where(x < 0, -e, e)


def _gelu_exact(x):
    # Matches PyTorch nn.GELU() default (erf form) to ~1.5e-7.
    return 0.5 * x * (1.0 + _erf_approx(x * 0.7071067811865476))


# ------------------------------- kernel --------------------------------------
def regressor_kernel(x_ref, w_ref, mt_ref, bd_ref, bp_ref, o_ref):
    x = x_ref[...]                                              # (B, 320) f32

    # Full-lane-width static row-range slices of the 320-lane weight slab.
    w_down_t = w_ref[:BOTTLENECK, :]                            # (160, 320)
    w_head = w_ref[BOTTLENECK:BOTTLENECK + JOINT_CHANNELS, :]   # ( 12, 320)

    # Head term on raw x: independent of the down/GELU chain, overlaps on MXU.
    y = jax.lax.dot_general(x, w_head, (((1,), (1,)), ((), ())),
                            preferred_element_type=jnp.float32)     # (B, 12)

    # Dependent chain: block-diag down + bias + exact GELU + folded up-into-head.
    h = jax.lax.dot_general(x, w_down_t, (((1,), (1,)), ((), ())),
                            preferred_element_type=jnp.float32)     # (B, 160)
    h = _gelu_exact(h + bd_ref[...])                                # (B, 160)
    y = y + jax.lax.dot_general(h, mt_ref[...], (((1,), (1,)), ((), ())),
                                preferred_element_type=jnp.float32)  # (B, 12)

    # NOTE: the (B, 12) store is lane-masked; padding the head weight to 128
    # output columns would make it unmasked but inflate the constant DMA ~10x,
    # so it is intentionally left as-is at this tiny output size.
    o_ref[...] = (y + bp_ref[...]).astype(o_ref.dtype)              # (B, 12)


# ------------------------------- wrapper --------------------------------------
@jax.jit
def regressor_forward(x, w320, m_t, bd_row, bp_row):
    b, c, t = x.shape
    x_flat = x.reshape(b, c * t)          # contiguous flatten: layout plumbing only

    vmem = pl.BlockSpec(memory_space=pltpu.MemorySpace.VMEM)
    y = pl.pallas_call(
        regressor_kernel,
        out_shape=jax.ShapeDtypeStruct((b, JOINT_CHANNELS), x.dtype),
        in_specs=[vmem, vmem, vmem, vmem, vmem],   # whole arrays, single-buffered
        out_specs=vmem,
    )(x_flat, w320, m_t, bd_row, bp_row)
    return y[:, None, :]                  # unsqueeze(1) -> (B, 1, J)


# --------------------------- weight packing -----------------------------------
def _block_diag_tile(w, copies):
    """(m, n) -> (copies*m, copies*n) block-diagonal with `copies` copies of w."""
    m, n = w.shape
    eye = jnp.eye(copies, dtype=w.dtype)
    return (eye[:, None, :, None] * w[None, :, None, :]).reshape(copies * m, copies * n)


def pack_weights(params):
    """Host-side constant packing + algebraic fold of the up-projection into the head."""
    prec = jax.lax.Precision.HIGHEST
    wd, bd = params["down_w"], params["down_b"]      # (16, 32), (16,)
    wu, bu = params["up_w"], params["up_b"]          # (32, 16), (32,)
    wh, bh = params["head_w"], params["head_b"]      # (12, 320), (12,)

    # 320-lane slab: block-diag down weight (contracted on lanes) + head weight.
    w_down_t = _block_diag_tile(wd, VOCAB_SIZE)                  # (160, 320)
    w320 = jnp.concatenate([w_down_t, wh], axis=0)               # (172, 320)
    assert w320.shape == (W320_ROWS, LANES)

    # Fold:  y = x@Wh^T + h@M + b'  with  M = blockdiag(Wu^T)@Wh^T,  b' = bh + tile(bu)@Wh^T.
    wh3 = wh.reshape(JOINT_CHANNELS, VOCAB_SIZE, HIDDEN)         # (12, C, 32)
    m3 = jnp.einsum("tk,jct->ckj", wu, wh3, precision=prec)      # (C, 16, 12)
    m_t = m3.reshape(BOTTLENECK, JOINT_CHANNELS).T               # (12, 160) lane-dense
    bu_tiled = jnp.tile(bu, VOCAB_SIZE)                          # (320,)
    b_prime = bh + jnp.einsum("f,jf->j", bu_tiled, wh, precision=prec)   # (12,)

    bd_row = jnp.tile(bd, VOCAB_SIZE)[None, :]                   # (1, 160)
    bp_row = b_prime[None, :]                                    # (1, 12)
    return w320, m_t, bd_row, bp_row


# --------------------------- params / reference -------------------------------
def init_params(key):
    k = jax.random.split(key, 6)
    return {
        "down_w": jax.random.normal(k[0], (HALF, HIDDEN), jnp.float32) / np.sqrt(HIDDEN),
        "down_b": jax.random.normal(k[1], (HALF,), jnp.float32) * 0.1,
        "up_w": jax.random.normal(k[2], (HIDDEN, HALF), jnp.float32) / np.sqrt(HALF),
        "up_b": jax.random.normal(k[3], (HIDDEN,), jnp.float32) * 0.1,
        "head_w": jax.random.normal(k[4], (JOINT_CHANNELS, LANES), jnp.float32)
                  / np.sqrt(LANES),
        "head_b": jax.random.normal(k[5], (JOINT_CHANNELS,), jnp.float32) * 0.1,
    }


def regressor_reference(x, p):
    """Un-folded reference, exact erf GELU (PyTorch nn.GELU() default)."""
    prec = jax.lax.Precision.HIGHEST
    h = jax.nn.gelu(
        jnp.einsum("bct,kt->bck", x, p["down_w"], precision=prec) + p["down_b"],
        approximate=False)
    a = x + jnp.einsum("bck,tk->bct", h, p["up_w"], precision=prec) + p["up_b"]
    flat = a.reshape(x.shape[0], -1)
    y = jnp.dot(flat, p["head_w"].T, precision=prec) + p["head_b"]
    return y[:, None, :]


# ---------------------------------- main ---------------------------------------
if __name__ == "__main__":
    key = jax.random.PRNGKey(0)
    kx, kp = jax.random.split(key)

    # x: (batch, vocab_size, hidden) — the (b, c, t) tensor of the Regressor.
    x = jax.random.normal(kx, (BATCH, VOCAB_SIZE, HIDDEN), jnp.float32)
    params = init_params(kp)
    w320, m_t, bd_row, bp_row = pack_weights(params)

    out = regressor_forward(x, w320, m_t, bd_row, bp_row)
    out = jax.block_until_ready(out)
    assert out.shape == (BATCH, 1, JOINT_CHANNELS)

    ref = regressor_reference(x, params)
    np.testing.assert_allclose(np.asarray(out), np.asarray(ref), rtol=1e-4, atol=1e-4)
    print("KERNEL_OK")
</pallas_src>

<mosaic_0001>
module attributes {stable_mosaic.version = 11 : i64} {
  func.func @regressor_kernel(%arg0: memref<2x320xf32, #tpu.memory_space<vmem>>, %arg1: memref<172x320xf32, #tpu.memory_space<vmem>>, %arg2: memref<12x160xf32, #tpu.memory_space<vmem>>, %arg3: memref<1x160xf32, #tpu.memory_space<vmem>>, %arg4: memref<1x12xf32, #tpu.memory_space<vmem>>, %arg5: memref<2x12xf32, #tpu.memory_space<vmem>>) attributes {dimension_semantics = [], scalar_prefetch = 0 : i64, scratch_operands = 0 : i64, tpu.core_type = #tpu.core_type<tc>} {
    %c0 = arith.constant 0 : index
    %c0_0 = arith.constant 0 : index
    %0 = vector.load %arg0[%c0, %c0_0] : memref<2x320xf32, #tpu.memory_space<vmem>>, vector<2x320xf32>
    %c0_1 = arith.constant 0 : index
    %c0_2 = arith.constant 0 : index
    %1 = vector.load %arg1[%c0_1, %c0_2] : memref<172x320xf32, #tpu.memory_space<vmem>>, vector<160x320xf32>
    %c160 = arith.constant 160 : index
    %c0_3 = arith.constant 0 : index
    %2 = vector.load %arg1[%c160, %c0_3] : memref<172x320xf32, #tpu.memory_space<vmem>>, vector<12x320xf32>
    %cst = arith.constant dense<0.000000e+00> : vector<2x12xf32>
    %3 = tpu.matmul %0, %2, %cst {dimension_numbers = #tpu.dot_dimension_numbers<[1], [1], [0], [0], [0, 0, 1, 0], [], []>} : vector<2x320xf32>, vector<12x320xf32>, vector<2x12xf32> -> vector<2x12xf32>
    %cst_4 = arith.constant dense<0.000000e+00> : vector<2x160xf32>
    %4 = tpu.matmul %0, %1, %cst_4 {dimension_numbers = #tpu.dot_dimension_numbers<[1], [1], [0], [0], [0, 0, 1, 0], [], []>} : vector<2x320xf32>, vector<160x320xf32>, vector<2x160xf32> -> vector<2x160xf32>
    %c0_5 = arith.constant 0 : index
    %c0_6 = arith.constant 0 : index
    %5 = vector.load %arg3[%c0_5, %c0_6] : memref<1x160xf32, #tpu.memory_space<vmem>>, vector<1x160xf32>
    %6 = vector.broadcast %5 : vector<1x160xf32> to vector<2x160xf32>
    %7 = arith.addf %4, %6 : vector<2x160xf32>
    %cst_7 = arith.constant 5.000000e-01 : f32
    %8 = vector.broadcast %cst_7 : f32 to vector<2x160xf32>
    %9 = arith.mulf %8, %7 : vector<2x160xf32>
    %cst_8 = arith.constant 0.707106769 : f32
    %10 = vector.broadcast %cst_8 : f32 to vector<2x160xf32>
    %11 = arith.mulf %7, %10 : vector<2x160xf32>
    %12 = math.absf %11 : vector<2x160xf32>
    %cst_9 = arith.constant 0.327591091 : f32
    %13 = vector.broadcast %cst_9 : f32 to vector<2x160xf32>
    %14 = arith.mulf %13, %12 : vector<2x160xf32>
    %cst_10 = arith.constant 1.000000e+00 : f32
    %15 = vector.broadcast %cst_10 : f32 to vector<2x160xf32>
    %16 = arith.addf %15, %14 : vector<2x160xf32>
    %cst_11 = arith.constant 1.000000e+00 : f32
    %17 = vector.broadcast %cst_11 : f32 to vector<2x160xf32>
    %18 = arith.divf %17, %16 : vector<2x160xf32>
    %cst_12 = arith.constant 1.06140542 : f32
    %19 = vector.broadcast %cst_12 : f32 to vector<2x160xf32>
    %20 = arith.mulf %19, %18 : vector<2x160xf32>
    %cst_13 = arith.constant -1.45315206 : f32
    %21 = vector.broadcast %cst_13 : f32 to vector<2x160xf32>
    %22 = arith.addf %20, %21 : vector<2x160xf32>
    %23 = arith.mulf %22, %18 : vector<2x160xf32>
    %cst_14 = arith.constant 1.42141378 : f32
    %24 = vector.broadcast %cst_14 : f32 to vector<2x160xf32>
    %25 = arith.addf %23, %24 : vector<2x160xf32>
    %26 = arith.mulf %25, %18 : vector<2x160xf32>
    %cst_15 = arith.constant -0.284496725 : f32
    %27 = vector.broadcast %cst_15 : f32 to vector<2x160xf32>
    %28 = arith.addf %26, %27 : vector<2x160xf32>
    %29 = arith.mulf %28, %18 : vector<2x160xf32>
    %cst_16 = arith.constant 0.254829586 : f32
    %30 = vector.broadcast %cst_16 : f32 to vector<2x160xf32>
    %31 = arith.addf %29, %30 : vector<2x160xf32>
    %32 = arith.mulf %31, %18 : vector<2x160xf32>
    %cst_17 = arith.constant 0.000000e+00 : f32
    %33 = vector.broadcast %cst_17 : f32 to vector<2x160xf32>
    %34 = arith.subf %33, %12 : vector<2x160xf32>
    %35 = arith.mulf %34, %12 : vector<2x160xf32>
    %36 = math.exp %35 : vector<2x160xf32>
    %37 = arith.mulf %32, %36 : vector<2x160xf32>
    %cst_18 = arith.constant 1.000000e+00 : f32
    %38 = vector.broadcast %cst_18 : f32 to vector<2x160xf32>
    %39 = arith.subf %38, %37 : vector<2x160xf32>
    %cst_19 = arith.constant 0.000000e+00 : f32
    %40 = vector.broadcast %cst_19 : f32 to vector<2x160xf32>
    %41 = arith.cmpf olt, %11, %40 : vector<2x160xf32>
    %cst_20 = arith.constant 0.000000e+00 : f32
    %42 = vector.broadcast %cst_20 : f32 to vector<2x160xf32>
    %43 = arith.subf %42, %39 : vector<2x160xf32>
    %44 = arith.select %41, %43, %39 : vector<2x160xi1>, vector<2x160xf32>
    %cst_21 = arith.constant 1.000000e+00 : f32
    %45 = vector.broadcast %cst_21 : f32 to vector<2x160xf32>
    %46 = arith.addf %45, %44 : vector<2x160xf32>
    %47 = arith.mulf %9, %46 : vector<2x160xf32>
    %c0_22 = arith.constant 0 : index
    %c0_23 = arith.constant 0 : index
    %48 = vector.load %arg2[%c0_22, %c0_23] : memref<12x160xf32, #tpu.memory_space<vmem>>, vector<12x160xf32>
    %cst_24 = arith.constant dense<0.000000e+00> : vector<2x12xf32>
    %49 = tpu.matmul %47, %48, %cst_24 {dimension_numbers = #tpu.dot_dimension_numbers<[1], [1], [0], [0], [0, 0, 1, 0], [], []>} : vector<2x160xf32>, vector<12x160xf32>, vector<2x12xf32> -> vector<2x12xf32>
    %50 = arith.addf %3, %49 : vector<2x12xf32>
    %c0_25 = arith.constant 0 : index
    %c0_26 = arith.constant 0 : index
    %51 = vector.load %arg4[%c0_25, %c0_26] : memref<1x12xf32, #tpu.memory_space<vmem>>, vector<1x12xf32>
    %52 = vector.broadcast %51 : vector<1x12xf32> to vector<2x12xf32>
    %53 = arith.addf %50, %52 : vector<2x12xf32>
    %c0_27 = arith.constant 0 : index
    %c0_28 = arith.constant 0 : index
    %54 = vector.load %arg5[%c0_27, %c0_28] : memref<2x12xf32, #tpu.memory_space<vmem>>, vector<2x12xf32>
    tpu.vector_store %arg5[%c0_27, %c0_28], %53 {strides = array<i32>} : memref<2x12xf32, #tpu.memory_space<vmem>>, vector<2x12xf32>,
    return
  }
}

</mosaic_0001>

<bundles_post_ra>
// kernel: regressor_forward.1
= control target key start
LH: loop header
LB: loop body
LE: loop exit
PB: predicated region body
PF: predicated region fallthrough
CT: control target
= control target key end

     0   :  { %10 = vsyncpa [#allocation3], 0  ;;  %s749_s0 = inlined_call_operand.vmem [shape: f32[2,320], index: 0, kind: input, shape index: {}]   ;;  %s750_s1 = inlined_call_operand.hbm [shape: f32[172,320], index: 1, kind: input, shape index: {}]   ;;  %s751_s2 = inlined_call_operand.vmem [shape: f32[12,160], index: 2, kind: input, shape index: {}]   ;;  %s752_s3 = inlined_call_operand.vmem [shape: f32[1,160], index: 3, kind: input, shape index: {}]   ;;  %s753_s4 = inlined_call_operand.vmem [shape: f32[1,12], index: 4, kind: input, shape index: {}]   ;;  %s754_s5 = inlined_call_operand.hbm [shape: f32[2,12], index: 5, kind: output, shape index: {}]  }
   0x1   :  { %11 = vsyncpa [#allocation4], 0  ;;  %s18_s20 = sshll.u32 %s750_s1, 4  ;;  %s625_s21 = smov [#allocation2]   ;;  %s19_s20 = int_to_ptr.hbm [resolvable:$true] %s18_s20 }
   0x2   :  { %s20_s22 = sshll.u32 %s625_s21, 4  ;;  %s626_s23 = smov 384   ;;  %s21_s22 = int_to_ptr.vmem [resolvable:$true] %s20_s22 }
   0x3   :  { %s627_s24 = smov 24  }
   0x4   :  { %26 = dma.hbm_to_vmem [thread:$0]  %s19_s20, 8448, %s21_s22, [#allocation3], %s626_s23, %s626_s23, %s627_s24  }
   0x5   :  { %621 = dma.done.wait [#allocation3], 8448  }
   0x6   :  { %622 = vsyncadd [#allocation3], 4294958848  ;;  %vm117_vm0 = vcmask 523264   ;;  %v85_v0 = vld [vmem:[#allocation2 + $0x178] sm:$0xff]  ;;  %v95_v1 = vld [vmem:[#allocation2 + $0x1c8] sm:$0xff]  ;;  %vm384_vm8 = vcmask 261120  }
   0x7   :  { %v83_v2 = vld [vmem:[#allocation2 + $0x168] sm:$0xff]  ;;  %532 = vmatpush.xpose.msk.msra.mxu2 %vm117_vm0, %v85_v0  ;;  %252 = vmatpush.xpose.msra.mxu3 %v95_v1  ;;  %v84_v3 = vld [vmem:[#allocation2 + $0x170] sm:$0xff]  ;;  %v82_v4 = vld [vmem:[#allocation2 + $0x160] sm:$0xff]  ;;  %s628_s10 = smov [#allocation5]   ;;  %s522_s14 = sshll.u32 %s754_s5, 4  ;;  %vm513_vm12 = vcmask 91136   ;;  %s523_s14 = int_to_ptr.hbm [resolvable:$true] %s522_s14 }
   0x8   :  { %180 = vmatpush.xpose.msra.mxu0 %v83_v2  ;;  %200 = vmatpush.xpose.msra.mxu1 %v84_v3  ;;  %v92_v5 = vld [vmem:[#allocation2 + $0x1b0] sm:$0xff]  ;;  %v81_v7 = vld [vmem:[#allocation2 + $0x158] sm:$0xff]  ;;  %v79_v8 = vld [vmem:[#allocation2 + $0x148] sm:$0xff]  ;;  %s520_s11 = sshll.u32 %s628_s10, 4  ;;  %s521_s11 = int_to_ptr.vmem [resolvable:$true] %s520_s11 }
   0x9   :  { %v80_v6 = vld [vmem:[#allocation2 + $0x150] sm:$0xff]  ;;  %v89_v9 = vld [vmem:[#allocation2 + $0x198] sm:$0xff]  ;;  %v78_v11 = vld [vmem:[#allocation2 + $0x140] sm:$0xff] }
   0xa   :  { %v77_v10 = vld [vmem:[#allocation2 + $0x138] sm:$0xff]  ;;  %v76_v13 = vld [vmem:[#allocation2 + $0x130] sm:$0xff]  ;;  %v86_v14 = vld [vmem:[#allocation2 + $0x180] sm:$0xff] }
   0xb   :  { %533 = vmatpush.xpose.msk.msra.mxu2 %vm117_vm0, %v82_v4  ;;  %253 = vmatpush.xpose.msra.mxu3 %v92_v5  ;;  %v37_v12 = vld [vmem:[%s749_s0] sm:$0x3f]  ;;  %v96_v15 = vld [vmem:[#allocation2 + $0x1d0] sm:$0xff]  ;;  %v74_v16 = vld [vmem:[#allocation2 + $0x120] sm:$0xff] }
   0xc   :  { %181 = vmatpush.xpose.msra.mxu0 %v80_v6  ;;  %201 = vmatpush.xpose.msra.mxu1 %v81_v7  ;;  %111 = vst [vmem:[#allocation1] ss:$4 sm:$0xff] %v37_v12  ;;  %v75_v17 = vld [vmem:[#allocation2 + $0x128] sm:$0xff]  ;;  %v73_v18 = vld [vmem:[#allocation2 + $0x118] sm:$0xff]  ;;  %v72_v21 = vld [vmem:[#allocation2 + $0x110] sm:$0xff] }
   0xd   :  { %v93_v19 = vld [vmem:[#allocation2 + $0x1b8] sm:$0xff]  ;;  %v71_v20 = vld [vmem:[#allocation2 + $0x108] sm:$0xff]  ;;  %v70_v25 = vld [vmem:[#allocation2 + $0x100] sm:$0xff] }
   0xe   :  { %v90_v26 = vld [vmem:[#allocation2 + $0x1a0] sm:$0xff]  ;;  %v68_v27 = vld [vmem:[#allocation2 + $0xf0] sm:$0xff]  ;;  %v69_v28 = vld [vmem:[#allocation2 + $0xf8] sm:$0xff] }
   0xf   :  { %534 = vmatpush.xpose.msk.msra.mxu2 %vm117_vm0, %v79_v8  ;;  %254 = vmatpush.xpose.msra.mxu3 %v89_v9  ;;  %v67_v29 = vld [vmem:[#allocation2 + $0xe8] sm:$0xff]  ;;  %v65_v31 = vld [vmem:[#allocation2 + $0xd8] sm:$0xff]  ;;  %v66_v33 = vld [vmem:[#allocation2 + $0xe0] sm:$0xff] }
  0x10   :  { %182 = vmatpush.xpose.msra.mxu0 %v77_v10  ;;  %202 = vmatpush.xpose.msra.mxu1 %v78_v11  ;;  %v87_v30 = vld [vmem:[#allocation2 + $0x188] sm:$0xff]  ;;  %v97_v32 = vld [vmem:[#allocation2 + $0x1d8] sm:$0xff]  ;;  %v64_v34 = vld [vmem:[#allocation2 + $0xd0] sm:$0xff] }
  0x11   :  { %v62_v35 = vld [vmem:[#allocation2 + $0xc0] sm:$0xff]  ;;  %v63_v37 = vld [vmem:[#allocation2 + $0xc8] sm:$0xff]  ;;  %v61_v38 = vld [vmem:[#allocation2 + $0xb8] sm:$0xff] }
  0x12   :  { %v94_v36 = vld [vmem:[#allocation2 + $0x1c0] sm:$0xff]  ;;  %v59_v39 = vld [vmem:[#allocation2 + $0xa8] sm:$0xff]  ;;  %v60_v41 = vld [vmem:[#allocation2 + $0xb0] sm:$0xff] }
  0x13   :  { %535 = vmatpush.xpose.msk.msra.mxu2 %vm117_vm0, %v76_v13  ;;  %255 = vmatpush.xpose.msra.mxu3 %v86_v14  ;;  %v669_v22 = vld.sshfl [vmem:[#allocation1] sm:$0xff pattern:$0x73625140]  ;;  %v673_v23 = vld.sshfl [vmem:[#allocation1 + $0x8] sm:$0xff pattern:$0x73625140] }
  0x14   :  { %183 = vmatpush.xpose.msra.mxu0 %v74_v16  ;;  %203 = vmatpush.xpose.msra.mxu1 %v75_v17  ;;  %v675_v24 = vld.sshfl [vmem:[#allocation1 + $0x10] sm:$0xff pattern:$0x73625140]  ;;  %v58_v42 = vld [vmem:[#allocation2 + $0xa0] sm:$0xff]  ;;  %v56_v43 = vld [vmem:[#allocation2 + $0x90] sm:$0xff] }
  0x15   :  { %434 = vst [vmem:[#allocation1] ss:$4 sm:$0xff] %v37_v12  ;;  %v91_v40 = vld [vmem:[#allocation2 + $0x1a8] sm:$0xff]  ;;  %v88_v44 = vld [vmem:[#allocation2 + $0x190] sm:$0xff]  ;;  %v57_v45 = vld [vmem:[#allocation2 + $0x98] sm:$0xff] }
  0x16   :  { %256 = vmatmul.f32.vlgmr.msra.gmra.mxu3 %v669_v22  ;;  %v55_v46 = vld [vmem:[#allocation2 + $0x88] sm:$0xff]  ;;  %v53_v47 = vld [vmem:[#allocation2 + $0x78] sm:$0xff]  ;;  %v54_v48 = vld [vmem:[#allocation2 + $0x80] sm:$0xff] }
  0x17   :  { %272 = vmatpush.xpose.msrb.mxu3 %v96_v15  ;;  %536 = vmatpush.xpose.msk.msra.mxu2 %vm117_vm0, %v73_v18  ;;  %v52_v49 = vld [vmem:[#allocation2 + $0x70] sm:$0xff]  ;;  %v50_v50 = vld [vmem:[#allocation2 + $0x60] sm:$0xff]  ;;  %v51_v51 = vld [vmem:[#allocation2 + $0x68] sm:$0xff] }
  0x18   :  { %184 = vmatpush.xpose.msra.mxu0 %v71_v20  ;;  %204 = vmatpush.xpose.msra.mxu1 %v72_v21  ;;  %v49_v52 = vld [vmem:[#allocation2 + $0x58] sm:$0xff]  ;;  %v47_v53 = vld [vmem:[#allocation2 + $0x48] sm:$0xff]  ;;  %v48_v54 = vld [vmem:[#allocation2 + $0x50] sm:$0xff] }
  0x19   :  { %v46_v55 = vld [vmem:[#allocation2 + $0x40] sm:$0xff]  ;;  %v44_v56 = vld [vmem:[#allocation2 + $0x30] sm:$0xff]  ;;  %v45_v57 = vld [vmem:[#allocation2 + $0x38] sm:$0xff] }
  0x1a   :  { %v43_v58 = vld [vmem:[#allocation2 + $0x28] sm:$0xff]  ;;  %v41_v59 = vld [vmem:[#allocation2 + $0x18] sm:$0xff]  ;;  %v42_v60 = vld [vmem:[#allocation2 + $0x20] sm:$0xff] }
  0x1b   :  { %273 = vmatpush.xpose.msrb.mxu3 %v93_v19  ;;  %537 = vmatpush.xpose.msk.msra.mxu2 %vm117_vm0, %v70_v25  ;;  %v40_v61 = vld [vmem:[#allocation2 + $0x10] sm:$0xff]  ;;  %v38_v62 = vld [vmem:[#allocation2] sm:$0xff]  ;;  %v39_v63 = vld [vmem:[#allocation2 + $0x8] sm:$0xff] }
  0x1c   :  { %185 = vmatpush.xpose.msra.mxu0 %v68_v27  ;;  %205 = vmatpush.xpose.msra.mxu1 %v69_v28  ;;  %v104_v1 = vld [vmem:[%s752_s3] sm:$0x3] }
  0x1d   :  { %v107_v2 = vperm.slane %v104_v1, 1  ;;  %v106_v12 = vperm.slane %v104_v1, 0  ;;  %v100_v1 = vld [vmem:[#allocation2 + $0x1f0] sm:$0xff] }
  0x1f   :  { %274 = vmatpush.xpose.msrb.mxu3 %v90_v26  ;;  %538 = vmatpush.xpose.msk.msra.mxu2 %vm117_vm0, %v67_v29 }
  0x20   :  { %186 = vmatpush.xpose.msra.mxu0 %v65_v31  ;;  %206 = vmatpush.xpose.msra.mxu1 %v66_v33 }
  0x23   :  { %275 = vmatpush.xpose.msrb.mxu3 %v87_v30  ;;  %539 = vmatpush.xpose.msk.msra.mxu2 %vm117_vm0, %v64_v34 }
  0x24   :  { %187 = vmatpush.xpose.msra.mxu0 %v62_v35  ;;  %207 = vmatpush.xpose.msra.mxu1 %v63_v37 }
  0x26   :  { %276 = vmatmul.f32.vlgmr.msrb.gmra.mxu3 %v673_v23 }
  0x27   :  { %549 = vmatpush.xpose.msk.msra.mxu3 %vm117_vm0, %v97_v32  ;;  %540 = vmatpush.xpose.msk.msra.mxu2 %vm117_vm0, %v61_v38  ;;  %v382_v38 = vld [vmem:[%s751_s2 + $0x10] sm:$0xf] }
  0x28   :  { %188 = vmatpush.xpose.msra.mxu0 %v59_v39  ;;  %208 = vmatpush.xpose.msra.mxu1 %v60_v41 }
  0x2b   :  { %550 = vmatpush.xpose.msk.msra.mxu3 %vm117_vm0, %v94_v36  ;;  %541 = vmatpush.xpose.msk.msra.mxu2 %vm117_vm0, %v58_v42 }
  0x2c   :  { %189 = vmatpush.xpose.msra.mxu0 %v56_v43  ;;  %209 = vmatpush.xpose.msra.mxu1 %v57_v45 }
  0x2f   :  { %551 = vmatpush.xpose.msk.msra.mxu3 %vm117_vm0, %v91_v40  ;;  %542 = vmatpush.xpose.msk.msra.mxu2 %vm117_vm0, %v55_v46 }
  0x30   :  { %190 = vmatpush.xpose.msra.mxu0 %v53_v47  ;;  %210 = vmatpush.xpose.msra.mxu1 %v54_v48 }
  0x33   :  { %552 = vmatpush.xpose.msk.msra.mxu3 %vm117_vm0, %v88_v44  ;;  %543 = vmatpush.xpose.msk.msra.mxu2 %vm117_vm0, %v52_v49  ;;  %v380_v44 = vld [vmem:[%s751_s2] sm:$0xff]  ;;  %v383_v49 = vld [vmem:[%s751_s2 + $0x18] sm:$0xf] }
  0x34   :  { %191 = vmatpush.xpose.msra.mxu0 %v50_v50  ;;  %211 = vmatpush.xpose.msra.mxu1 %v51_v51  ;;  %v103_v50 = vld [vmem:[#allocation2 + $0x208] sm:$0xf] }
  0x36   :  { %553 = vmatmul.msk.f32.vlgmr.msra.gmra.mxu3 %vm117_vm0, %v675_v24 }
  0x37   :  { %544 = vmatpush.xpose.msk.msra.mxu2 %vm117_vm0, %v49_v52  ;;  %408 = vmatpush.xpose.msrb.mxu3 %v382_v38 }
  0x38   :  { %192 = vmatpush.xpose.msra.mxu0 %v47_v53  ;;  %212 = vmatpush.xpose.msra.mxu1 %v48_v54  ;;  %v381_v54 = vld [vmem:[%s751_s2 + $0x8] sm:$0xff] }
  0x3b   :  { %545 = vmatpush.xpose.msk.msra.mxu2 %vm117_vm0, %v46_v55  ;;  %409 = vmatpush.xpose.msrb.mxu3 %v380_v44 }
  0x3c   :  { %193 = vmatpush.xpose.msra.mxu0 %v44_v56  ;;  %213 = vmatpush.xpose.msra.mxu1 %v45_v57 }
  0x3f   :  { %546 = vmatpush.xpose.msk.msra.mxu2 %vm117_vm0, %v43_v58  ;;  %554 = vmatpush.xpose.msk.msra.mxu3 %vm384_vm8, %v383_v49 }
  0x40   :  { %194 = vmatpush.xpose.msra.mxu0 %v41_v59  ;;  %214 = vmatpush.xpose.msra.mxu1 %v42_v60 }
  0x43   :  { %547 = vmatpush.xpose.msk.msra.mxu2 %vm117_vm0, %v40_v61  ;;  %555 = vmatpush.xpose.msk.msra.mxu3 %vm384_vm8, %v381_v54 }
  0x44   :  { %195 = vmatpush.xpose.msra.mxu0 %v38_v62  ;;  %215 = vmatpush.xpose.msra.mxu1 %v39_v63  ;;  %v101_v63 = vld [vmem:[#allocation2 + $0x1f8] sm:$0xf] }
  0x46   :  { %548 = vmatmul.msk.f32.vlgmr.msra.gmra.mxu2 %vm117_vm0, %v675_v24 }
  0x47   :  { %196 = vmatmul.f32.vlgmr.msra.gmra.mxu0 %v669_v22  ;;  %216 = vmatmul.f32.vlgmr.msra.gmra.mxu1 %v673_v23 }
  0x48   :  { %557 = vmatpush.xpose.msk.msrb.mxu2 %vm117_vm0, %v103_v50  ;;  %462 = vmatpush.xpose.msrb.mxu0 %v101_v63 }
  0x4c   :  { %558 = vmatpush.xpose.msk.msrb.mxu2 %vm117_vm0, %v100_v1 }
  0x99   :  { %v257_v0 = vpop.f32.mrf.mxu3 }
  0x9a   :  { %v258_v4 = vadd.f32 %v257_v0, %v107_v2  ;;  %v102_v0 = vld [vmem:[#allocation2 + $0x200] sm:$0xf] }
  0x9b   :  { %482 = vmatpush.xpose.msrb.mxu1 %v102_v0 }
  0xa9   :  { %v277_v3 = vpop.f32.mrf.mxu3 }
  0xaa   :  { %v278_v5 = vadd.f32 %v277_v3, %v258_v4  ;;  %v98_v4 = vld [vmem:[#allocation2 + $0x1e0] sm:$0xff] }
  0xab   :  { %463 = vmatpush.xpose.msrb.mxu0 %v98_v4 }
  0xb9   :  { %v297_v6 = vpop.f32.mrf.mxu3 }
  0xba   :  { %v702_v7 = vadd.f32 %v297_v6, %v278_v5  ;;  %v99_v5 = vld [vmem:[#allocation2 + $0x1e8] sm:$0xff] }
  0xbb   :  { %483 = vmatpush.xpose.msrb.mxu1 %v99_v5 }
  0xbc   :  { %v705_v8 = vmul.f32 0.70710677, %v702_v7 }
  0xbe   :  { %v305_v9 = vand.u32 2147483647, %v705_v8  ;;  %vm371_vm11 = vcmp.lt.f32.partialorder %v705_v8, 0.0  ;;  %v564_v8 = vld [vmem:[%s753_s4] ss:$0 sm:$0xff] }
  0xc0   :  { %v307_v10 = vmul.f32 0.3275911, %v305_v9  ;;  %v359_v46 = vsub.f32 0.0, %v305_v9 }
  0xc2   :  { %v309_v11 = vadd.f32 1.0, %v307_v10  ;;  %v361_v56 = vmul.f32 %v359_v46, %v305_v9  ;;  %v437_v10 = vld.sshfl [vmem:[#allocation1 + $0x10] sm:$0xff pattern:$0x73625140] }
  0xc3   :  { %559 = vmatmul.msk.f32.vlgmr.msrb.gmra.mxu2 %vm117_vm0, %v437_v10 }
  0xc4   :  { %565 = vrcp.f32 %v309_v11  ;;  %v197_v14 = vpop.f32.mrf.mxu0  ;;  %v217_v17 = vpop.f32.mrf.mxu1  ;;  %vm330_vm1 = vweird.f32 %v309_v11  ;;  %v336_v18 = vand.u32 2147483648, %v309_v11  ;;  %v334_v20 = vand.u32 2147483647, %v309_v11 }
  0xc5   :  { %v198_v16 = vadd.f32 %v197_v14, %v106_v12  ;;  %v364_v61 = vmul.f32 1.442695, %v361_v56 }
  0xc6   :  { %v337_v24 = vor.u32 1.1754944e-38, %v336_v18  ;;  %vm335_vm4 = vcmp.eq.f32.partialorder %v334_v20, 8.507059e+37 }
  0xc7   :  { %v218_v21 = vadd.f32 %v217_v17, %v198_v16 }
  0xc9   :  { %v237_v23 = vpop.f32.mrf.mxu2 }
  0xca   :  { %v566_v13 = vpop.eup %565  ;;  %v708_v25 = vadd.f32 %v237_v23, %v218_v21 }
  0xcb   :  { %v326_v15 = vmul.f32 %v566_v13, %v309_v11  ;;  %vm331_vm2 = vweird.f32 %v566_v13  ;;  %v435_v11 = vld.sshfl [vmem:[#allocation1] sm:$0xff pattern:$0x73625140] }
  0xcc   :  { %vm332_vm3 = vmor %vm330_vm1, %vm331_vm2  ;;  %v711_v27 = vmul.f32 0.70710677, %v708_v25  ;;  %464 = vmatmul.f32.vlgmr.msrb.gmra.mxu0 %v435_v11 }
  0xcd   :  { %v327_v19 = vsub.f32 1.0, %v326_v15 }
  0xce   :  { %v304_v30 = vand.u32 2147483647, %v711_v27  ;;  %vm370_vm10 = vcmp.lt.f32.partialorder %v711_v27, 0.0 }
  0xcf   :  { %v328_v22 = vmul.f32 %v566_v13, %v327_v19 }
  0xd0   :  { %v306_v31 = vmul.f32 0.3275911, %v304_v30  ;;  %v358_v53 = vsub.f32 0.0, %v304_v30 }
  0xd1   :  { %v329_v26 = vadd.f32 %v566_v13, %v328_v22 }
  0xd2   :  { %v308_v33 = vadd.f32 1.0, %v306_v31  ;;  %v360_v59 = vmul.f32 %v358_v53, %v304_v30  ;;  %v300_v30 = vmul.f32 0.5, %v708_v25 }
  0xd3   :  { %v333_v28 = vsel %vm332_vm3, %v566_v13, %v329_v26  ;;  %v436_v13 = vld.sshfl [vmem:[#allocation1 + $0x8] sm:$0xff pattern:$0x73625140] }
  0xd4   :  { %v713_v29 = vsel %vm335_vm4, %v337_v24, %v333_v28  ;;  %567 = vrcp.f32 %v308_v33  ;;  %v321_v41 = vand.u32 2147483648, %v308_v33  ;;  %v319_v43 = vand.u32 2147483647, %v308_v33  ;;  %484 = vmatmul.f32.vlgmr.msrb.gmra.mxu1 %v436_v13 }
  0xd5   :  { %v341_v32 = vmul.f32 1.0614054, %v713_v29  ;;  %vm315_vm6 = vweird.f32 %v308_v33  ;;  %v362_v3 = vmul.f32 1.442695, %v360_v59  ;;  %569 = vpow2.f32 %v364_v61 }
  0xd6   :  { %v322_v48 = vor.u32 1.1754944e-38, %v321_v41  ;;  %vm320_vm9 = vcmp.eq.f32.partialorder %v319_v43, 8.507059e+37 }
  0xd7   :  { %v343_v34 = vadd.f32 -1.4531521, %v341_v32  ;;  %571 = vpow2.f32 %v362_v3 }
  0xd9   :  { %v345_v35 = vmul.f32 %v343_v34, %v713_v29  ;;  %v301_v34 = vmul.f32 0.5, %v702_v7 }
  0xda   :  { %v568_v36 = vpop.eup %567 }
  0xdb   :  { %v311_v37 = vmul.f32 %v568_v36, %v308_v33  ;;  %v347_v39 = vadd.f32 1.4214138, %v345_v35  ;;  %vm316_vm5 = vweird.f32 %v568_v36  ;;  %v570_v17 = vpop.eup %569 }
  0xdc   :  { %vm317_vm7 = vmor %vm315_vm6, %vm316_vm5 }
  0xdd   :  { %v312_v40 = vsub.f32 1.0, %v311_v37  ;;  %v349_v45 = vmul.f32 %v347_v39, %v713_v29  ;;  %v572_v20 = vpop.eup %571 }
  0xdf   :  { %v313_v42 = vmul.f32 %v568_v36, %v312_v40  ;;  %v351_v55 = vadd.f32 -0.28449672, %v349_v45 }
  0xe1   :  { %v314_v47 = vadd.f32 %v568_v36, %v313_v42  ;;  %v353_v60 = vmul.f32 %v351_v55, %v713_v29 }
  0xe3   :  { %v318_v51 = vsel %vm317_vm7, %v568_v36, %v314_v47  ;;  %v355_v6 = vadd.f32 0.2548296, %v353_v60 }
  0xe4   :  { %v323_v52 = vsel %vm320_vm9, %v322_v48, %v318_v51 }
  0xe5   :  { %v340_v57 = vmul.f32 1.0614054, %v323_v52  ;;  %v357_v14 = vmul.f32 %v355_v6, %v713_v29 }
  0xe7   :  { %v342_v58 = vadd.f32 -1.4531521, %v340_v57  ;;  %v367_v18 = vmul.f32 %v570_v17, %v357_v14 }
  0xe9   :  { %v344_v62 = vmul.f32 %v342_v58, %v323_v52  ;;  %v369_v22 = vsub.f32 1.0, %v367_v18 }
  0xeb   :  { %v346_v2 = vadd.f32 1.4214138, %v344_v62  ;;  %v373_v26 = vsub.f32 0.0, %v369_v22 }
  0xed   :  { %v348_v9 = vmul.f32 %v346_v2, %v323_v52  ;;  %v375_v32 = vsel %vm371_vm11, %v373_v26, %v369_v22 }
  0xee   :  { %v377_v33 = vadd.f32 1.0, %v375_v32 }
  0xef   :  { %v350_v12 = vadd.f32 -0.28449672, %v348_v9 }
  0xf0   :  { %v379_v35 = vmul.f32 %v377_v33, %v301_v34 }
  0xf1   :  { %v352_v15 = vmul.f32 %v350_v12, %v323_v52 }
  0xf3   :  { %v354_v16 = vadd.f32 0.2548296, %v352_v15 }
  0xf5   :  { %v356_v19 = vmul.f32 %v354_v16, %v323_v52 }
  0xf7   :  { %v366_v21 = vmul.f32 %v572_v20, %v356_v19 }
  0xf9   :  { %v368_v23 = vsub.f32 1.0, %v366_v21 }
  0xfb   :  { %v372_v24 = vsub.f32 0.0, %v368_v23 }
  0xfd   :  { %v374_v28 = vsel %vm370_vm10, %v372_v24, %v368_v23 }
  0xfe   :  { %v376_v31 = vadd.f32 1.0, %v374_v28 }
 0x100   :  { %v378_v29 = vmul.f32 %v376_v31, %v300_v30 }
 0x102   :  { %410 = vmatmul.f32.vlgmr.msrb.gmra.mxu3 %v378_v29 }
 0x10a   :  { %556 = vmatmul.msk.f32.vlgmr.msra.gmra.mxu3 %vm384_vm8, %v379_v35 }
 0x146   :  { %v505_v41 = vpop.f32.mrf.mxu2 }
 0x149   :  { %v465_v38 = vpop.f32.mrf.mxu0 }
 0x151   :  { %v485_v39 = vpop.f32.mrf.mxu1 }
 0x185   :  { %v411_v36 = vpop.f32.mrf.mxu3 }
 0x18d   :  { %v431_v37 = vpop.f32.mrf.mxu3 }
 0x18e   :  { %v432_v27 = vadd.f32 %v431_v37, %v411_v36 }
 0x190   :  { %v466_v40 = vadd.f32 %v465_v38, %v432_v27 }
 0x192   :  { %v486_v25 = vadd.f32 %v485_v39, %v466_v40 }
 0x194   :  { %v506_v7 = vadd.f32 %v505_v41, %v486_v25 }
 0x196   :  { %v512_v42 = vadd.f32 %v564_v8, %v506_v7 }
 0x198   :  { %514 = vst.msk [vmem:[#allocation5] sm:$0x3] %vm513_vm12, %v512_v42 }
 0x199   :  { %525 = dma.vmem_to_hbm [thread:$0]  %s521_s11, 32, %s523_s14, [#allocation4]  }
 0x19a   :  { %623 = dma.done.wait [#allocation4], 32  }
 0x19b   :  { %624 = vsyncadd [#allocation4], 4294967264 }
 0x19c   :  { %530 = vsyncpa [#allocation3], 1 }
 0x19d   :  { %531 = vsyncpa [#allocation4], 1 }

</bundles_post_ra>
